<compile_context>
chip_gen: v7x
topology: tpu7x:2x2x1
jax: 0.10.0
libtpu: 0.0.40
codegen_flags: <defaults>
</compile_context>

<pallas_src>
import functools

import jax
import jax.numpy as jnp
from jax.experimental import pallas as pl
from jax.experimental.pallas import tpu as pltpu


def _round_up(x: int, m: int) -> int:
    return ((x + m - 1) // m) * m


def qnetwork_kernel(x_ref, w1_ref, b1_ref, w2_ref, b2_ref, w3_ref, b3_ref, o_ref):
    # x tile: [tb, state_dim]; weights stored as [in, out]; biases [1, out] f32.
    x = x_ref[...]

    # fc1 + ReLU (MXU matmul, f32 accumulate; bias/ReLU on the VPU in f32).
    h1 = jnp.dot(x.astype(w1_ref.dtype), w1_ref[...],
                 preferred_element_type=jnp.float32) + b1_ref[...]
    h1 = jnp.maximum(h1, 0.0)

    # fc2 + ReLU
    h2 = jnp.dot(h1.astype(w2_ref.dtype), w2_ref[...],
                 preferred_element_type=jnp.float32) + b2_ref[...]
    h2 = jnp.maximum(h2, 0.0)

    # fc3 (no activation); output block is the true (tb, action_dim) slab.
    q = jnp.dot(h2.astype(w3_ref.dtype), w3_ref[...],
                preferred_element_type=jnp.float32) + b3_ref[...]
    o_ref[...] = q.astype(o_ref.dtype)


def _choose_tile_b(B: int, tile_b: int) -> int:
    """Pick a batch tile: multiple of 8 (or == B), balanced across >=2 grid
    steps when B >= 16 so v7x's second TensorCore gets even work."""
    if B < 16:
        return B  # single full-extent block; always a legal block shape
    n_tiles = max(2, pl.cdiv(B, tile_b))
    return _round_up(pl.cdiv(B, n_tiles), 8)


@functools.partial(jax.jit, static_argnames=("tile_b",))
def qnetwork_forward(state, params, *, tile_b: int = 2048):
    """state: [B, state_dim]. params: dict w1,b1,w2,b2,w3,b3 with W as [in, out],
    biases as [1, out] (kept f32). Pass bf16 weights on v6e/v7x if desired."""
    w1, b1 = params["w1"], params["b1"]
    w2, b2 = params["w2"], params["b2"]
    w3, b3 = params["w3"], params["b3"]

    B, state_dim = state.shape
    hidden1 = w1.shape[1]
    hidden2 = w2.shape[1]
    action_dim = w3.shape[1]

    # bf16 weights -> stream x in bf16 too (halves the x DMA; cast once here).
    x = state.astype(jnp.bfloat16) if w1.dtype == jnp.bfloat16 else state

    tb = _choose_tile_b(B, tile_b)
    grid = (pl.cdiv(B, tb),)

    pinned = lambda a: pl.BlockSpec(a.shape, lambda i: (0,) * a.ndim)

    flops = 2 * B * (state_dim * hidden1 + hidden1 * hidden2 + hidden2 * action_dim)
    bytes_accessed = (
        B * state_dim * x.dtype.itemsize
        + sum(a.size * a.dtype.itemsize for a in (w1, b1, w2, b2, w3, b3))
        + B * action_dim * 4
    )

    q = pl.pallas_call(
        qnetwork_kernel,
        out_shape=jax.ShapeDtypeStruct((B, action_dim), jnp.float32),
        grid=grid,
        in_specs=[
            pl.BlockSpec((tb, state_dim), lambda i: (i, 0)),  # x: streamed per tile
            pinned(w1), pinned(b1),
            pinned(w2), pinned(b2),
            pinned(w3), pinned(b3),
        ],
        out_specs=pl.BlockSpec((tb, action_dim), lambda i: (i, 0)),
        compiler_params=pltpu.CompilerParams(
            dimension_semantics=("parallel",),  # shard batch tiles across TCs (v7x)
        ),
        cost_estimate=pl.CostEstimate(
            flops=flops, transcendentals=0, bytes_accessed=bytes_accessed
        ),
    )(x, w1, b1, w2, b2, w3, b3)

    return q


def init_params(key, state_dim, action_dim, hidden_dim1, hidden_dim2, dtype=jnp.float32):
    """Mimics nn.Linear init: uniform(-1/sqrt(fan_in), 1/sqrt(fan_in)).
    Weights stored as [in, out] (transposed vs PyTorch's [out, in]); biases [1, out]
    kept in f32 (bias add happens in f32 regardless). Pass dtype=jnp.bfloat16 for
    bf16 MXU inputs on v6e/v7x; keep f32 on v5e."""
    ks = jax.random.split(key, 6)

    def linear(kw, kb, fan_in, fan_out):
        bound = 1.0 / jnp.sqrt(jnp.float32(fan_in))
        w = jax.random.uniform(kw, (fan_in, fan_out), jnp.float32, -bound, bound)
        b = jax.random.uniform(kb, (1, fan_out), jnp.float32, -bound, bound)
        return w.astype(dtype), b  # biases stay f32

    w1, b1 = linear(ks[0], ks[1], state_dim, hidden_dim1)
    w2, b2 = linear(ks[2], ks[3], hidden_dim1, hidden_dim2)
    w3, b3 = linear(ks[4], ks[5], hidden_dim2, action_dim)
    return {"w1": w1, "b1": b1, "w2": w2, "b2": b2, "w3": w3, "b3": b3}


if __name__ == "__main__":
    # Small shapes consistent with a DDQN Q-network for the toy car env.
    batch, state_dim, action_dim = 8, 8, 4
    hidden_dim1, hidden_dim2 = 32, 32

    key = jax.random.PRNGKey(0)
    k_params, k_state = jax.random.split(key)
    params = init_params(k_params, state_dim, action_dim, hidden_dim1, hidden_dim2)
    state = jax.random.normal(k_state, (batch, state_dim), jnp.float32)

    q = qnetwork_forward(state, params)
    jax.block_until_ready(q)

    # Cross-check against plain-JAX reference.
    def ref(x, p):
        h1 = jnp.maximum(x @ p["w1"] + p["b1"], 0.0)
        h2 = jnp.maximum(h1 @ p["w2"] + p["b2"], 0.0)
        return h2 @ p["w3"] + p["b3"]

    expected = ref(state, params)
    assert q.shape == (batch, action_dim)
    assert jnp.allclose(q, expected, atol=1e-5, rtol=1e-5)

    # Exercise the multi-tile path with a non-multiple-of-8 / non-multiple-of-tile
    # batch (typical DDQN minibatch) to verify the masked partial last block and
    # the balanced >=2-step grid.
    big_state = jax.random.normal(jax.random.PRNGKey(1), (300, state_dim), jnp.float32)
    q_big = qnetwork_forward(big_state, params)
    jax.block_until_ready(q_big)
    assert q_big.shape == (300, action_dim)
    assert jnp.allclose(q_big, ref(big_state, params), atol=1e-5, rtol=1e-5)

    print("KERNEL_OK")
</pallas_src>

<mosaic_0001>
module attributes {stable_mosaic.version = 11 : i64} {
  func.func @qnetwork_kernel(%arg0: i32, %arg1: memref<8x8xf32, #tpu.memory_space<vmem>>, %arg2: memref<8x32xf32, #tpu.memory_space<vmem>>, %arg3: memref<1x32xf32, #tpu.memory_space<vmem>>, %arg4: memref<32x32xf32, #tpu.memory_space<vmem>>, %arg5: memref<1x32xf32, #tpu.memory_space<vmem>>, %arg6: memref<32x4xf32, #tpu.memory_space<vmem>>, %arg7: memref<1x4xf32, #tpu.memory_space<vmem>>, %arg8: memref<8x4xf32, #tpu.memory_space<vmem>>) attributes {dimension_semantics = [#tpu.dimension_semantics<parallel>], iteration_bounds = array<i64: 1>, scalar_prefetch = 0 : i64, scratch_operands = 0 : i64, tpu.core_type = #tpu.core_type<tc>, window_params = [{transform_indices = @transform_0, window_bounds = array<i64: 8, 8>}, {pipeline_mode = #tpu.pipeline_mode<synchronous>, transform_indices = @transform_1, window_bounds = array<i64: 8, 32>}, {pipeline_mode = #tpu.pipeline_mode<synchronous>, transform_indices = @transform_2, window_bounds = array<i64: 1, 32>}, {pipeline_mode = #tpu.pipeline_mode<synchronous>, transform_indices = @transform_3, window_bounds = array<i64: 32, 32>}, {pipeline_mode = #tpu.pipeline_mode<synchronous>, transform_indices = @transform_4, window_bounds = array<i64: 1, 32>}, {pipeline_mode = #tpu.pipeline_mode<synchronous>, transform_indices = @transform_5, window_bounds = array<i64: 32, 4>}, {pipeline_mode = #tpu.pipeline_mode<synchronous>, transform_indices = @transform_6, window_bounds = array<i64: 1, 4>}, {transform_indices = @transform_7, window_bounds = array<i64: 8, 4>}]} {
    %c0 = arith.constant 0 : index
    %c0_0 = arith.constant 0 : index
    %0 = vector.load %arg1[%c0, %c0_0] : memref<8x8xf32, #tpu.memory_space<vmem>>, vector<8x8xf32>
    %c0_1 = arith.constant 0 : index
    %c0_2 = arith.constant 0 : index
    %1 = vector.load %arg2[%c0_1, %c0_2] : memref<8x32xf32, #tpu.memory_space<vmem>>, vector<8x32xf32>
    %cst = arith.constant dense<0.000000e+00> : vector<8x32xf32>
    %2 = tpu.matmul %0, %1, %cst {dimension_numbers = #tpu.dot_dimension_numbers<[1], [0], [0], [1], [0, 0, 1, 1], [], []>} : vector<8x8xf32>, vector<8x32xf32>, vector<8x32xf32> -> vector<8x32xf32>
    %c0_3 = arith.constant 0 : index
    %c0_4 = arith.constant 0 : index
    %3 = vector.load %arg3[%c0_3, %c0_4] : memref<1x32xf32, #tpu.memory_space<vmem>>, vector<1x32xf32>
    %4 = vector.broadcast %3 : vector<1x32xf32> to vector<8x32xf32>
    %5 = arith.addf %2, %4 : vector<8x32xf32>
    %cst_5 = arith.constant 0.000000e+00 : f32
    %6 = vector.broadcast %cst_5 : f32 to vector<8x32xf32>
    %7 = arith.maximumf %5, %6 : vector<8x32xf32>
    %c0_6 = arith.constant 0 : index
    %c0_7 = arith.constant 0 : index
    %8 = vector.load %arg4[%c0_6, %c0_7] : memref<32x32xf32, #tpu.memory_space<vmem>>, vector<32x32xf32>
    %cst_8 = arith.constant dense<0.000000e+00> : vector<8x32xf32>
    %9 = tpu.matmul %7, %8, %cst_8 {dimension_numbers = #tpu.dot_dimension_numbers<[1], [0], [0], [1], [0, 0, 1, 1], [], []>} : vector<8x32xf32>, vector<32x32xf32>, vector<8x32xf32> -> vector<8x32xf32>
    %c0_9 = arith.constant 0 : index
    %c0_10 = arith.constant 0 : index
    %10 = vector.load %arg5[%c0_9, %c0_10] : memref<1x32xf32, #tpu.memory_space<vmem>>, vector<1x32xf32>
    %11 = vector.broadcast %10 : vector<1x32xf32> to vector<8x32xf32>
    %12 = arith.addf %9, %11 : vector<8x32xf32>
    %cst_11 = arith.constant 0.000000e+00 : f32
    %13 = vector.broadcast %cst_11 : f32 to vector<8x32xf32>
    %14 = arith.maximumf %12, %13 : vector<8x32xf32>
    %c0_12 = arith.constant 0 : index
    %c0_13 = arith.constant 0 : index
    %15 = vector.load %arg6[%c0_12, %c0_13] : memref<32x4xf32, #tpu.memory_space<vmem>>, vector<32x4xf32>
    %cst_14 = arith.constant dense<0.000000e+00> : vector<8x4xf32>
    %16 = tpu.matmul %14, %15, %cst_14 {dimension_numbers = #tpu.dot_dimension_numbers<[1], [0], [0], [1], [0, 0, 1, 1], [], []>} : vector<8x32xf32>, vector<32x4xf32>, vector<8x4xf32> -> vector<8x4xf32>
    %c0_15 = arith.constant 0 : index
    %c0_16 = arith.constant 0 : index
    %17 = vector.load %arg7[%c0_15, %c0_16] : memref<1x4xf32, #tpu.memory_space<vmem>>, vector<1x4xf32>
    %18 = vector.broadcast %17 : vector<1x4xf32> to vector<8x4xf32>
    %19 = arith.addf %16, %18 : vector<8x4xf32>
    %c0_17 = arith.constant 0 : index
    %c0_18 = arith.constant 0 : index
    %20 = vector.load %arg8[%c0_17, %c0_18] : memref<8x4xf32, #tpu.memory_space<vmem>>, vector<8x4xf32>
    tpu.vector_store %arg8[%c0_17, %c0_18], %19 {strides = array<i32>} : memref<8x4xf32, #tpu.memory_space<vmem>>, vector<8x4xf32>,
    return
  }
  func.func @transform_0(%arg0: i32) -> (i32, i32) {
    %c0_i32 = arith.constant 0 : i32
    %c0_i32_0 = arith.constant 0 : i32
    return %arg0, %c0_i32 : i32, i32
  }
  func.func @transform_1(%arg0: i32) -> (i32, i32) {
    %c0_i32 = arith.constant 0 : i32
    %c0_i32_0 = arith.constant 0 : i32
    %c0_i32_1 = arith.constant 0 : i32
    return %c0_i32, %c0_i32_0 : i32, i32
  }
  func.func @transform_2(%arg0: i32) -> (i32, i32) {
    %c0_i32 = arith.constant 0 : i32
    %c0_i32_0 = arith.constant 0 : i32
    %c0_i32_1 = arith.constant 0 : i32
    return %c0_i32, %c0_i32_0 : i32, i32
  }
  func.func @transform_3(%arg0: i32) -> (i32, i32) {
    %c0_i32 = arith.constant 0 : i32
    %c0_i32_0 = arith.constant 0 : i32
    %c0_i32_1 = arith.constant 0 : i32
    return %c0_i32, %c0_i32_0 : i32, i32
  }
  func.func @transform_4(%arg0: i32) -> (i32, i32) {
    %c0_i32 = arith.constant 0 : i32
    %c0_i32_0 = arith.constant 0 : i32
    %c0_i32_1 = arith.constant 0 : i32
    return %c0_i32, %c0_i32_0 : i32, i32
  }
  func.func @transform_5(%arg0: i32) -> (i32, i32) {
    %c0_i32 = arith.constant 0 : i32
    %c0_i32_0 = arith.constant 0 : i32
    %c0_i32_1 = arith.constant 0 : i32
    return %c0_i32, %c0_i32_0 : i32, i32
  }
  func.func @transform_6(%arg0: i32) -> (i32, i32) {
    %c0_i32 = arith.constant 0 : i32
    %c0_i32_0 = arith.constant 0 : i32
    %c0_i32_1 = arith.constant 0 : i32
    return %c0_i32, %c0_i32_0 : i32, i32
  }
  func.func @transform_7(%arg0: i32) -> (i32, i32) {
    %c0_i32 = arith.constant 0 : i32
    %c0_i32_0 = arith.constant 0 : i32
    return %arg0, %c0_i32 : i32, i32
  }
}

</mosaic_0001>

<bundles_post_ra>
// kernel: qnetwork_forward.1
= control target key start
LH: loop header
LB: loop body
LE: loop exit
PB: predicated region body
PF: predicated region fallthrough
CT: control target
= control target key end

     0   :  { %vm35_vm0 = vcmask 64512   ;;  %v346_v0 = vmov 0.0   ;;  %vm347_vm1 = vmmov 0   ;;  %v348_v4 = vmov 0.0|0.0   ;;  %s431_s1 = inlined_call_operand.vmem [shape: f32[8,32], index: 1, kind: input, shape index: {}]   ;;  %s432_s0 = inlined_call_operand.vmem [shape: f32[8,8], index: 0, kind: input, shape index: {}]   ;;  %s433_s3 = inlined_call_operand.vmem [shape: f32[32,32], index: 3, kind: input, shape index: {}]   ;;  %s434_s5 = inlined_call_operand.vmem [shape: f32[32,4], index: 5, kind: input, shape index: {}]   ;;  %s435_s2 = inlined_call_operand.vmem [shape: f32[1,32], index: 2, kind: input, shape index: {}]   ;;  %s436_s4 = inlined_call_operand.vmem [shape: f32[1,32], index: 4, kind: input, shape index: {}]   ;;  %s437_s6 = inlined_call_operand.vmem [shape: f32[1,4], index: 6, kind: input, shape index: {}]   ;;  %s438_s7 = inlined_call_operand.vmem [shape: f32[8,4], index: 7, kind: output, shape index: {}]  }
   0x1   :  { %304 = vmatprep.subr.mxu0 %v346_v0  ;;  %v27_v1 = vld [vmem:[%s431_s1] sm:$0xff]  ;;  %306 = vmatprep.mubr.msk.f32.mxu0 %vm347_vm1, %v346_v0  ;;  %v111_v5 = vld [vmem:[%s433_s3 + $0x8] sm:$0xff]  ;;  %v112_v7 = vld [vmem:[%s433_s3 + $0x10] sm:$0xff]  ;;  %vm121_vm2 = vcmask 261120   ;;  %vm280_vm3 = vcmask 31744  }
   0x2   :  { %v26_v2 = vld [vmem:[%s432_s0] sm:$0xff]  ;;  %305 = vmatpush3.msra.mxu0 %v27_v1  ;;  %331 = vmatprep.subr.bf16.mxu1 %v348_v4  ;;  %v113_v8 = vld [vmem:[%s433_s3 + $0x18] sm:$0xff]  ;;  %v197_v11 = vld [vmem:[%s434_s5 + $0x8] sm:$0xff] }
   0x3   :  { %v110_v3 = vld [vmem:[%s433_s3] sm:$0xff]  ;;  %307 = vmatmul.mubr.msk.f32.vlgmr.msra.gmra.mrb[0].mxu0 %vm35_vm0, %v26_v2  ;;  %317 = vmatprep.mubr.msk.f32.mxu1 %vm347_vm1, %v346_v0  ;;  %v335_v9 = vpack.c.bf16 %v113_v8, %v112_v7  ;;  %v198_v18 = vld [vmem:[%s434_s5 + $0x10] sm:$0xff]  ;;  %v199_v19 = vld [vmem:[%s434_s5 + $0x18] sm:$0xff] }
   0x4   :  { %v332_v6 = vpack.c.bf16 %v111_v5, %v110_v3  ;;  %337 = vmatprep.subr.bf16.mxu0 %v348_v4  ;;  %328 = vmatprep.mubr.msk.f32.mxu0 %vm347_vm1, %v346_v0  ;;  %v196_v10 = vld [vmem:[%s434_s5] sm:$0xff]  ;;  %v341_v20 = vpack.c.bf16 %v199_v19, %v198_v18 }
   0x5   :  { %v338_v12 = vpack.c.bf16 %v197_v11, %v196_v10  ;;  %v286_v13 = vld [vmem:[%s435_s2] ss:$0 sm:$0xff] }
   0x6   :  { %333 = vmatpush3.bf16.msra.mxu1 %v332_v6  ;;  %v288_v21 = vld [vmem:[%s436_s4] ss:$0 sm:$0xff] }
   0x7   :  { %334 = vmatprep.subr.bf16.mxu1 %v348_v4  ;;  %339 = vmatpush3.bf16.msra.mxu0 %v338_v12  ;;  %v290_v26 = vld [vmem:[%s437_s6] ss:$0 sm:$0xff] }
   0x8   :  { %340 = vmatprep.subr.bf16.mxu0 %v348_v4 }
   0xa   :  { %336 = vmatpush3.bf16.msra.mxu1 %v335_v9 }
   0xb   :  { %342 = vmatpush3.bf16.msra.mxu0 %v341_v20 }
  0xd6   :  { %v105_v14 = vpop.f32.mrb[0].mxu0 }
  0xd7   :  { %v106_v15 = vadd.f32 %v286_v13, %v105_v14  ;;  %v308_v16 = vpop.f32.mrb[1].mxu0 }
  0xd9   :  { %v109_v17 = vmax.f32 %v106_v15, 0.0 }
  0xdb   :  { %318 = vmatmul.mubr.msk.f32.vlgmr.msra.gmra.mrb[0].mxu1 %vm121_vm2, %v109_v17 }
 0x1ae   :  { %v191_v22 = vpop.f32.mrb[0].mxu1 }
 0x1af   :  { %v192_v23 = vadd.f32 %v288_v21, %v191_v22  ;;  %v319_v24 = vpop.f32.mrb[1].mxu1 }
 0x1b1   :  { %v195_v25 = vmax.f32 %v192_v23, 0.0 }
 0x1b3   :  { %329 = vmatmul.mubr.msk.f32.vlgmr.msra.gmra.mrb[2].mxu0 %vm121_vm2, %v195_v25 }
 0x286   :  { %v276_v27 = vpop.f32.mrb[2].mxu0 }
 0x287   :  { %v277_v28 = vadd.f32 %v290_v26, %v276_v27  ;;  %v330_v29 = vpop.f32.mrb[3].mxu0 }
 0x289   :  { %281 = vst.msk [vmem:[%s438_s7] sm:$0xff] %vm280_vm3, %v277_v28 }

</bundles_post_ra>
